<compile_context>
chip_gen: v7x
topology: tpu7x:2x2x1
jax: 0.10.0
libtpu: 0.0.40
codegen_flags: <defaults>
</compile_context>

<pallas_src>
import functools

import jax
import jax.numpy as jnp
from jax.experimental import pallas as pl
from jax.experimental.pallas import tpu as pltpu

_LANE = 128
_SUBLANE = 8
# Conservative per-call VMEM working-set budget: comfortably inside v5e/v6e
# (128 MiB physical) and v7x (64 MiB physical) once vmem_limit_bytes is set.
_VMEM_BUDGET = 28 * 1024 * 1024


def _round_up(v, m):
    return (v + m - 1) // m * m


def _action_encoder_kernel(x_ref, wt_ref, b_ref, o_ref):
    # x_ref: (tm, A), wt_ref: (A, OUT), b_ref: (1, OUT), o_ref: (tm, OUT)
    acc = jnp.dot(x_ref[...], wt_ref[...],
                  preferred_element_type=jnp.float32)      # MXU, f32 accumulate
    # Bias add / epilogue in f32 on the VPU (v5e has no bf16 VALU);
    # single cast at the store keeps the output lane-dense.
    o_ref[...] = (acc + b_ref[...].astype(jnp.float32)).astype(o_ref.dtype)


def prepare_action_encoder_params(weight, bias, param_dtype=None):
    """One-time parameter prep (do this at init, NOT per forward call).

    weight: (OUT, A)  [PyTorch nn.Linear layout]
    bias:   (OUT,)
    Returns (wt, b2) with wt: (A, OUT) lane-dense for the MXU, b2: (1, OUT).
    param_dtype=jnp.bfloat16 halves weight HBM bytes for this memory-bound op;
    accumulation in the kernel stays f32.
    """
    wt = jnp.asarray(weight).T
    b2 = jnp.asarray(bias).reshape(1, -1)
    if param_dtype is not None:
        wt = wt.astype(param_dtype)
        b2 = b2.astype(param_dtype)
    return wt, b2


def _cost(B, A, OUT, x_it, w_it, o_it):
    return pl.CostEstimate(
        flops=2 * B * A * OUT,
        transcendentals=0,
        bytes_accessed=(B * A * x_it + A * OUT * w_it
                        + OUT * w_it + B * OUT * o_it),
    )


def _single_tile_vmem(B, A, OUT, x_it, w_it, o_it):
    """VMEM bytes for the no-grid path (whole arrays resident, no pipeline)."""
    a_pad = _round_up(A, _LANE)
    out_pad = _round_up(OUT, _LANE)
    rows = _round_up(B, _SUBLANE)
    return (rows * a_pad * x_it                      # x
            + rows * out_pad * o_it                  # out
            + _round_up(A, _SUBLANE) * out_pad * w_it  # weight
            + _SUBLANE * out_pad * o_it)             # bias (padded)


def _pick_grid_tile(B, A, OUT, x_it, w_it, o_it, max_tile):
    """Largest batch tile whose double-buffered working set fits the budget,
    preferring a tile that divides B (full, unmasked last block)."""
    a_pad = _round_up(A, _LANE)
    out_pad = _round_up(OUT, _LANE)
    per_row = 2 * (a_pad * x_it + out_pad * o_it)           # x + out, 2 buffers
    fixed = (2 * _round_up(A, _SUBLANE) * out_pad * w_it    # weight (resident)
             + 2 * _SUBLANE * out_pad * o_it)               # bias
    tile = max((_VMEM_BUDGET - fixed) // per_row, _SUBLANE)
    tile = min(tile, max_tile, B)
    tile = max(_SUBLANE, (tile // _SUBLANE) * _SUBLANE)
    if B % tile == 0:
        return tile
    # Fall back to power-of-two candidates <= tile that divide B.
    c = 1
    while c * 2 <= tile:
        c *= 2
    while c >= 2 * _SUBLANE:
        if B % c == 0:
            return c
        c //= 2
    return tile  # last block masked on store (correct, slightly slower)


@functools.partial(
    jax.jit,
    static_argnames=("num_action_tokens", "embed_dim",
                     "single_tile_rows", "max_grid_tile"))
def action_encoder_forward(x, wt, b2, *, num_action_tokens, embed_dim,
                           single_tile_rows=8192, max_grid_tile=4096):
    """x: (B, A); wt: (A, OUT) pre-transposed; b2: (1, OUT).

    Returns (B, num_action_tokens, embed_dim).
    """
    B, A = x.shape
    OUT = wt.shape[1]
    assert OUT == num_action_tokens * embed_dim
    x_it, w_it, o_it = x.dtype.itemsize, wt.dtype.itemsize, x.dtype.itemsize
    cost = _cost(B, A, OUT, x_it, w_it, o_it)

    single_need = _single_tile_vmem(B, A, OUT, x_it, w_it, o_it)
    single_ok = (B <= single_tile_rows) and (single_need <= _VMEM_BUDGET)

    if single_ok:
        # Latency path: no grid, no pipeline — one VMEM tile, one MXU dot.
        vmem_limit = min(max(int(single_need * 1.2) + (1 << 20), 32 << 20),
                         40 << 20)
        y = pl.pallas_call(
            _action_encoder_kernel,
            out_shape=jax.ShapeDtypeStruct((B, OUT), x.dtype),
            in_specs=[
                pl.BlockSpec(memory_space=pltpu.MemorySpace.VMEM),
                pl.BlockSpec(memory_space=pltpu.MemorySpace.VMEM),
                pl.BlockSpec(memory_space=pltpu.MemorySpace.VMEM),
            ],
            out_specs=pl.BlockSpec(memory_space=pltpu.MemorySpace.VMEM),
            compiler_params=pltpu.CompilerParams(
                vmem_limit_bytes=vmem_limit),
            cost_estimate=cost,
        )(x, wt, b2)
    else:
        # Throughput path: large batch tiles (amortize ~0.35 us/step), weight
        # and bias resident (constant index_map), OUT lane-dense, batch axis
        # "parallel" so v7x's two TensorCores share the grid.
        tile = _pick_grid_tile(B, A, OUT, x_it, w_it, o_it, max_grid_tile)
        a_pad = _round_up(A, _LANE)
        out_pad = _round_up(OUT, _LANE)
        grid_need = (2 * tile * (a_pad * x_it + out_pad * o_it)
                     + 2 * _round_up(A, _SUBLANE) * out_pad * w_it
                     + 2 * _SUBLANE * out_pad * o_it)
        vmem_limit = min(max(int(grid_need * 1.2) + (1 << 20), 32 << 20),
                         40 << 20)
        grid = (pl.cdiv(B, tile),)
        y = pl.pallas_call(
            _action_encoder_kernel,
            out_shape=jax.ShapeDtypeStruct((B, OUT), x.dtype),
            grid_spec=pltpu.PrefetchScalarGridSpec(
                num_scalar_prefetch=0,
                grid=grid,
                in_specs=[
                    pl.BlockSpec((tile, A), lambda i: (i, 0)),
                    # Constant index maps -> stay resident, no re-DMA per step.
                    pl.BlockSpec((A, OUT), lambda i: (0, 0)),
                    pl.BlockSpec((1, OUT), lambda i: (0, 0)),
                ],
                out_specs=pl.BlockSpec((tile, OUT), lambda i: (i, 0)),
            ),
            compiler_params=pltpu.CompilerParams(
                dimension_semantics=("parallel",),
                vmem_limit_bytes=vmem_limit),
            cost_estimate=cost,
        )(x, wt, b2)

    # Metadata-only row-major view, same as PyTorch .view(-1, T, E).
    return y.reshape(B, num_action_tokens, embed_dim)


if __name__ == "__main__":
    # Small shapes consistent with the module's forward:
    #   action_space_dim=25, embed_dim=32, num_action_tokens=8, batch=2
    action_space_dim = 25
    embed_dim = 32
    num_action_tokens = 8
    batch = 2
    out_features = embed_dim * num_action_tokens

    key = jax.random.PRNGKey(0)
    kx, kw, kb, kx2 = jax.random.split(key, 4)

    x = jax.random.normal(kx, (batch, action_space_dim), dtype=jnp.float32)
    # nn.Linear parameter shapes: weight (out, in), bias (out,)
    weight = jax.random.normal(
        kw, (out_features, action_space_dim), dtype=jnp.float32) * 0.02
    bias = jax.random.normal(kb, (out_features,), dtype=jnp.float32) * 0.01

    # One-time param prep (hoisted out of the per-call hot path).
    wt, b2 = prepare_action_encoder_params(weight, bias)

    # --- small-batch (no-grid, single VMEM tile) path, f32 ---
    out = action_encoder_forward(
        x, wt, b2, num_action_tokens=num_action_tokens, embed_dim=embed_dim)
    out = jax.block_until_ready(out)
    ref = (x @ weight.T + bias).reshape(batch, num_action_tokens, embed_dim)
    assert out.shape == (batch, num_action_tokens, embed_dim)
    assert jnp.allclose(out, ref, atol=1e-4, rtol=1e-4)

    # --- large-batch path: force the batch-tiled grid (4 full tiles) ---
    big_batch = 1024
    x_big = jax.random.normal(kx2, (big_batch, action_space_dim),
                              dtype=jnp.float32)
    out_big = action_encoder_forward(
        x_big, wt, b2, num_action_tokens=num_action_tokens,
        embed_dim=embed_dim, single_tile_rows=256, max_grid_tile=256)
    out_big = jax.block_until_ready(out_big)
    ref_big = (x_big @ weight.T + bias).reshape(
        big_batch, num_action_tokens, embed_dim)
    assert jnp.allclose(out_big, ref_big, atol=1e-4, rtol=1e-4)

    # --- bf16 parameter/activation path (half DMA bytes, f32 accumulate) ---
    wt16, b216 = prepare_action_encoder_params(
        weight, bias, param_dtype=jnp.bfloat16)
    out16 = action_encoder_forward(
        x_big.astype(jnp.bfloat16), wt16, b216,
        num_action_tokens=num_action_tokens, embed_dim=embed_dim)
    out16 = jax.block_until_ready(out16)
    assert jnp.allclose(out16.astype(jnp.float32), ref_big,
                        atol=3e-2, rtol=3e-2)

    print("KERNEL_OK")
</pallas_src>

<mosaic_0001>
module attributes {stable_mosaic.version = 11 : i64} {
  func.func @_action_encoder_kernel(%arg0: memref<2x25xf32, #tpu.memory_space<vmem>>, %arg1: memref<25x256xf32, #tpu.memory_space<vmem>>, %arg2: memref<1x256xf32, #tpu.memory_space<vmem>>, %arg3: memref<2x256xf32, #tpu.memory_space<vmem>>) attributes {dimension_semantics = [], scalar_prefetch = 0 : i64, scratch_operands = 0 : i64, tpu.core_type = #tpu.core_type<tc>} {
    %c0 = arith.constant 0 : index
    %c0_0 = arith.constant 0 : index
    %0 = vector.load %arg0[%c0, %c0_0] : memref<2x25xf32, #tpu.memory_space<vmem>>, vector<2x25xf32>
    %c0_1 = arith.constant 0 : index
    %c0_2 = arith.constant 0 : index
    %1 = vector.load %arg1[%c0_1, %c0_2] : memref<25x256xf32, #tpu.memory_space<vmem>>, vector<25x256xf32>
    %cst = arith.constant dense<0.000000e+00> : vector<2x256xf32>
    %2 = tpu.matmul %0, %1, %cst {dimension_numbers = #tpu.dot_dimension_numbers<[1], [0], [0], [1], [0, 0, 1, 1], [], []>} : vector<2x25xf32>, vector<25x256xf32>, vector<2x256xf32> -> vector<2x256xf32>
    %c0_3 = arith.constant 0 : index
    %c0_4 = arith.constant 0 : index
    %3 = vector.load %arg2[%c0_3, %c0_4] : memref<1x256xf32, #tpu.memory_space<vmem>>, vector<1x256xf32>
    %4 = vector.broadcast %3 : vector<1x256xf32> to vector<2x256xf32>
    %5 = arith.addf %2, %4 : vector<2x256xf32>
    %c0_5 = arith.constant 0 : index
    %c0_6 = arith.constant 0 : index
    %6 = vector.load %arg3[%c0_5, %c0_6] : memref<2x256xf32, #tpu.memory_space<vmem>>, vector<2x256xf32>
    tpu.vector_store %arg3[%c0_5, %c0_6], %5 {strides = array<i32>} : memref<2x256xf32, #tpu.memory_space<vmem>>, vector<2x256xf32>,
    return
  }
}

</mosaic_0001>

<bundles_post_ra>
// kernel: action_encoder_forward.1
= control target key start
LH: loop header
LB: loop body
LE: loop exit
PB: predicated region body
PF: predicated region fallthrough
CT: control target
= control target key end

     0   :  { %8 = vsyncpa [#allocation3], 0  ;;  %s292_s0 = inlined_call_operand.hbm [shape: f32[2,25], index: 0, kind: input, shape index: {}]   ;;  %s293_s1 = inlined_call_operand.hbm [shape: f32[25,256], index: 1, kind: input, shape index: {}]   ;;  %s294_s2 = inlined_call_operand.vmem [shape: f32[1,256], index: 2, kind: input, shape index: {}]   ;;  %s295_s3 = inlined_call_operand.vmem [shape: f32[2,256], index: 3, kind: output, shape index: {}]  }
   0x1   :  { %9 = vsyncpa [#allocation5], 0  ;;  %s229_s12 = smov [#allocation2]   ;;  %s230_s14 = smov [#allocation4]  }
   0x2   :  { %s16_s13 = sshll.u32 %s229_s12, 4  ;;  %s25_s15 = sshll.u32 %s230_s14, 4  ;;  %s17_s13 = int_to_ptr.vmem [resolvable:$true] %s16_s13  ;;  %s255_s15 = int_to_ptr.vmem [resolvable:$true] %s25_s15 }
   0x3   :  { %s181_s18 = scalar_lea.hbm %s292_s0, 32 }
   0x4   :  { %p182_p0 = scmp.ne.s32.totalorder %s292_s0, %s181_s18  ;;  %p185_p1 = scmp.lt.u32.totalorder %s181_s18, %s292_s0 }
   0x6   :  { %p187_p2 = pnand %p185_p1, %p182_p0 }
   0x8   :  { %190 = shalt.err (!%p187_p2)
}
   0x9   :  { %s191_s23 = scalar_lea.vmem %s17_s13, 32  ;;  %p196_p4 = scmp.lt.s32.totalorder %s17_s13, %s17_s13 }
   0xa   :  { %p192_p3 = scmp.ne.s32.totalorder %s17_s13, %s191_s23  ;;  %p197_p5 = scmp.lt.s32.totalorder %s191_s23, %s191_s23 }
   0xc   :  { %p198_p6 = por %p197_p5, %p196_p4 }
   0xe   :  { %p199_p7 = pnand %p198_p6, %p192_p3 }
  0x10   :  { %202 = shalt.err (!%p199_p7)
}
  0x11   :  { %19 = dma.hbm_to_vmem [thread:$0]  %s292_s0, 32, %s17_s13, [#allocation3]  }
  0x12   :  { %s203_s28 = scalar_lea.hbm %s293_s1, 1024 }
  0x13   :  { %p204_p8 = scmp.ne.s32.totalorder %s293_s1, %s203_s28  ;;  %p207_p9 = scmp.lt.u32.totalorder %s203_s28, %s293_s1 }
  0x15   :  { %p209_p10 = pnand %p207_p9, %p204_p8 }
  0x17   :  { %212 = shalt.err (!%p209_p10)
}
  0x18   :  { %s213_s6 = scalar_lea.vmem %s255_s15, 1024  ;;  %p218_p12 = scmp.lt.s32.totalorder %s255_s15, %s255_s15 }
  0x19   :  { %p214_p11 = scmp.ne.s32.totalorder %s255_s15, %s213_s6  ;;  %p219_p13 = scmp.lt.s32.totalorder %s213_s6, %s213_s6 }
  0x1b   :  { %p220_p0 = por %p219_p13, %p218_p12 }
  0x1d   :  { %p221_p1 = pnand %p220_p0, %p214_p11 }
  0x1f   :  { %224 = shalt.err (!%p221_p1)
}
  0x20   :  { %s231_s0 = smov 256   ;;  %s232_s7 = smov 16  }
  0x21   :  { %31 = dma.hbm_to_vmem [thread:$0]  %s293_s1, 1024, %s255_s15, [#allocation5], %s231_s0, %s231_s0, %s232_s7  }
  0x22   :  { %225 = dma.done.wait [#allocation3], 32  }
  0x23   :  { %226 = vsyncadd [#allocation3], 4294967264 }
  0x24   :  { %227 = dma.done.wait [#allocation5], 1024  }
  0x25   :  { %228 = vsyncadd [#allocation5], 4294966272  ;;  %v233_v0 = vmov 0.0   ;;  %vm65_vm0 = vcmask 1040384   ;;  %v42_v1 = vld [vmem:[#allocation4 + $0x8] sm:$0xff]  ;;  %v44_v2 = vld [vmem:[#allocation4 + $0x18] sm:$0xff]  ;;  %v51_v14 = vlaneseq }
  0x26   :  { %136 = vmatprep.mubr.f32.mxu0 %v233_v0  ;;  %v41_v3 = vld [vmem:[#allocation4] sm:$0xff]  ;;  %v165_v4 = vpack.c.bf16 %v44_v2, %v42_v1  ;;  %v43_v5 = vld [vmem:[#allocation4 + $0x10] sm:$0xff]  ;;  %v46_v6 = vld [vmem:[#allocation4 + $0x28] sm:$0xff]  ;;  %vm234_vm1 = vmmov 1   ;;  %vm61_vm3 = vcmask 203776  }
  0x27   :  { %v48_v7 = vld [vmem:[#allocation4 + $0x38] sm:$0x1]  ;;  %v167_v8 = vpack.c.bf16 %v43_v5, %v41_v3  ;;  %vm170_vm2 = vmpackc.low %vm65_vm0, %vm234_vm1  ;;  %v45_v10 = vld [vmem:[#allocation4 + $0x20] sm:$0xff]  ;;  %v52_v15 = vshrl.u32 %v51_v14, 7 }
  0x28   :  { %v169_v9 = vpack.c.bf16 %v48_v7, %v46_v6  ;;  %v47_v11 = vld [vmem:[#allocation4 + $0x30] sm:$0x1]  ;;  %166 = vmatprep.subr.bf16.mxu0 %v165_v4  ;;  %v40_v13 = vld [vmem:[#allocation2] sm:$0x3]  ;;  %v49_v17 = vld [vmem:[%s294_s2] sm:$0x3] }
  0x29   :  { %168 = vmatpush1.bf16.msra.mxu0 %v167_v8  ;;  %v172_v12 = vpack.c.bf16 %v47_v11, %v45_v10  ;;  %v53_v16 = vsub.s32 0, %v52_v15  ;;  %v57_v18 = vsub.s32 1, %v52_v15 }
  0x2a   :  { %171 = vmatprep.subr.msk.bf16.mxu0 %vm170_vm2, %v169_v9 }
  0x2b   :  { %v54_v19 = vrot.slane %v49_v17, %v53_v16  ;;  %v58_v20 = vrot.slane %v49_v17, %v57_v18 }
  0x2d   :  { %174 = vmatpush1.bf16.msk.msra.mxu0 %vm170_vm2, %v172_v12 }
  0x30   :  { %163 = vmatmul.mubr.msk.f32.vlgmr.msra.gmra.mrb[0].mxu0 %vm61_vm3, %v40_v13 }
 0x103   :  { %v138_v21 = vpop.f32.mrb[0].mxu0 }
 0x104   :  { %v139_v22 = vadd.f32 %v138_v21, %v54_v19  ;;  %v140_v23 = vpop.f32.mrb[1].mxu0 }
 0x105   :  { %v141_v24 = vadd.f32 %v140_v23, %v58_v20 }
 0x107   :  { %v145_v25 = vcombine.low %v139_v22, %v141_v24 }
 0x109   :  { %164 = vst.sshfl [vmem:[%s295_s3] sm:$0x33 pattern:$0x76325410] %v145_v25 }
 0x10a   :  { %159 = vsyncpa [#allocation3], 1 }
 0x10b   :  { %160 = vsyncpa [#allocation5], 1 }

</bundles_post_ra>
